<compile_context>
chip_gen: v5e
topology: v5e:2x2
jax: 0.10.0
libtpu: 0.0.40
codegen_flags: <defaults>
</compile_context>

<pallas_src>
import jax
import jax.numpy as jnp
from jax.experimental import pallas as pl
from jax.experimental.pallas import tpu as pltpu

# Problem sizes (small, consistent with the module's forward).
B, C_IN, H, W = 2, 4, 16, 16
C_MID = 8
NUM_CLASSES = 10
KH = KW = 3                      # 3x3 conv, padding=1, stride=1
HW = H * W                       # 256
BHW = B * H * W                  # 512  (lane axis of the hot path)
K_COLS = C_IN * KH * KW          # 36   im2col contraction rows
K_AUG = K_COLS + 1               # +1 ones row  (folds conv bias; 36 pads to 40 anyway)
W_ROWS = C_MID + NUM_CLASSES     # 18   packed-weight rows

_HIGH = jax.lax.Precision.HIGHEST


def light_cls_kernel(xcols_ref, wpack_ref, out_ref):
    """Fused encoder + classifier.

    xcols_ref: (K_AUG, BHW)   = (37, 512)  im2col + ones row (lane-dense)
    wpack_ref: (W_ROWS, K_AUG)= (18, 37)
               rows 0..7   : [conv W (8,36) | conv bias column]
               rows 8..17  : cols 0..7  = fc W^T * (1/(H*W))
                             col  8     = fc bias
                             cols 9..36 = 0
    out_ref  : (NUM_CLASSES, B) = (10, 2)  logits^T
    """
    w_enc = wpack_ref[0:C_MID, :]                                    # (8, 37)
    w_cls = wpack_ref[C_MID:C_MID + NUM_CLASSES, 0:C_MID]            # (10, 8)
    b_cls = wpack_ref[C_MID:C_MID + NUM_CLASSES, C_MID:C_MID + 1]    # (10, 1)

    # Conv (+ bias via the ones row) as ONE matmul: (8,37)@(37,512).
    feat = jnp.dot(w_enc, xcols_ref[...],
                   preferred_element_type=jnp.float32,
                   precision=_HIGH)                                  # (8, 512)
    feat = jnp.maximum(feat, 0.0)                                    # ReLU (VPU)

    # Global average pool: per-batch lane-block sums (XLU reduce); the 1/(H*W)
    # scale is already folded into w_cls.  Columns are ordered (b, h, w), so
    # batch b occupies lanes [b*HW, (b+1)*HW) -- 128-lane aligned static slices.
    gap = jnp.concatenate(
        [jnp.sum(feat[:, b * HW:(b + 1) * HW], axis=-1, keepdims=True)
         for b in range(B)], axis=-1)                                # (8, B)

    # Classifier: (10,8)@(8,B) + bias (VPU add).
    logits_t = jnp.dot(w_cls, gap, preferred_element_type=jnp.float32,
                       precision=_HIGH) + b_cls                      # (10, B)
    out_ref[...] = logits_t.astype(out_ref.dtype)


@jax.jit
def light_classification_forward(x_nchw, wconv_oihw, bconv, wfc, bfc):
    """Wrapper: cheap prep (transpose tiny input, pad, im2col, weight packing),
    then a single 2-operand Pallas call."""
    x = x_nchw.astype(jnp.float32)

    # Transpose the tiny raw input first (B,Cin,H,W) -> (Cin,B,H,W), then pad;
    # avoids materializing a transposed copy of the big im2col intermediate.
    x_t = jnp.transpose(x, (1, 0, 2, 3))                             # (Cin, B, H, W)
    x_pad = jnp.pad(x_t, ((0, 0), (0, 0), (1, 1), (1, 1)))           # (Cin, B, H+2, W+2)

    # im2col: contraction order (cin, kh, kw); columns ordered (b, h, w).
    taps = [x_pad[:, :, kh:kh + H, kw:kw + W]
            for kh in range(KH) for kw in range(KW)]                 # 9 x (Cin,B,H,W)
    cols = jnp.stack(taps, axis=1)                                   # (Cin, 9, B, H, W)
    cols = cols.reshape(K_COLS, BHW)                                 # (36, 512)
    x_cols = jnp.concatenate(
        [cols, jnp.ones((1, BHW), jnp.float32)], axis=0)             # (37, 512)

    # Packed weights (18, 37): encoder rows then classifier rows.
    w_enc = jnp.concatenate(
        [wconv_oihw.astype(jnp.float32).reshape(C_MID, K_COLS),
         bconv.astype(jnp.float32)[:, None]], axis=1)                # (8, 37)
    w_cls_blk = jnp.zeros((NUM_CLASSES, K_AUG), jnp.float32)
    w_cls_blk = w_cls_blk.at[:, 0:C_MID].set(
        wfc.astype(jnp.float32).T / float(HW))                       # 1/(H*W) folded in
    w_cls_blk = w_cls_blk.at[:, C_MID].set(bfc.astype(jnp.float32))  # bias column
    w_pack = jnp.concatenate([w_enc, w_cls_blk], axis=0)             # (18, 37)

    vmem = pl.BlockSpec(memory_space=pltpu.MemorySpace.VMEM)
    flops = (2 * C_MID * K_AUG * BHW          # conv matmul
             + 2 * C_MID * BHW                # relu + gap reduction
             + 2 * NUM_CLASSES * C_MID * B    # classifier matmul
             + NUM_CLASSES * B)               # bias add
    bytes_accessed = 4 * (K_AUG * BHW + W_ROWS * K_AUG + NUM_CLASSES * B)

    logits_t = pl.pallas_call(
        light_cls_kernel,
        out_shape=jax.ShapeDtypeStruct((NUM_CLASSES, B), jnp.float32),
        in_specs=[vmem, vmem],
        out_specs=vmem,
        cost_estimate=pl.CostEstimate(flops=flops, transcendentals=0,
                                      bytes_accessed=bytes_accessed),
    )(x_cols, w_pack)

    return logits_t.T                                                # (B, NUM_CLASSES)


def reference_forward(x_nchw, wconv_oihw, bconv, wfc, bfc):
    """Pure-JAX reference matching PyTorch semantics (NCHW conv, pad=1)."""
    y = jax.lax.conv_general_dilated(
        x_nchw.astype(jnp.float32), wconv_oihw.astype(jnp.float32),
        window_strides=(1, 1), padding=((1, 1), (1, 1)),
        dimension_numbers=('NCHW', 'OIHW', 'NCHW'), precision=_HIGH)
    y = y + bconv.reshape(1, C_MID, 1, 1)
    y = jnp.maximum(y, 0.0)
    gap = jnp.mean(y, axis=(2, 3))                                   # (B, Cmid)
    return jnp.dot(gap, wfc, precision=_HIGH) + bfc


if __name__ == "__main__":
    key = jax.random.PRNGKey(0)
    k_x, k_wc, k_bc, k_wf, k_bf = jax.random.split(key, 5)

    x = jax.random.normal(k_x, (B, C_IN, H, W), jnp.float32)
    wconv = jax.random.normal(k_wc, (C_MID, C_IN, KH, KW), jnp.float32) * 0.1
    bconv = jax.random.normal(k_bc, (C_MID,), jnp.float32) * 0.1
    wfc = jax.random.normal(k_wf, (C_MID, NUM_CLASSES), jnp.float32) * 0.1
    bfc = jax.random.normal(k_bf, (NUM_CLASSES,), jnp.float32) * 0.1

    pred = light_classification_forward(x, wconv, bconv, wfc, bfc)
    pred = jax.block_until_ready(pred)

    ref = reference_forward(x, wconv, bconv, wfc, bfc)
    assert pred.shape == (B, NUM_CLASSES)
    assert jnp.allclose(pred, ref, atol=1e-4, rtol=1e-4), (pred, ref)

    print("KERNEL_OK")
</pallas_src>

<mosaic_0001>
module attributes {stable_mosaic.version = 11 : i64} {
  func.func @light_cls_kernel(%arg0: memref<37x512xf32, #tpu.memory_space<vmem>>, %arg1: memref<18x37xf32, #tpu.memory_space<vmem>>, %arg2: memref<10x2xf32, #tpu.memory_space<vmem>>) attributes {dimension_semantics = [], scalar_prefetch = 0 : i64, scratch_operands = 0 : i64, tpu.core_type = #tpu.core_type<tc>} {
    %c0 = arith.constant 0 : index
    %c0_0 = arith.constant 0 : index
    %0 = vector.load %arg1[%c0, %c0_0] : memref<18x37xf32, #tpu.memory_space<vmem>>, vector<8x37xf32>
    %c8 = arith.constant 8 : index
    %c0_1 = arith.constant 0 : index
    %1 = vector.load %arg1[%c8, %c0_1] : memref<18x37xf32, #tpu.memory_space<vmem>>, vector<10x8xf32>
    %c8_2 = arith.constant 8 : index
    %c8_3 = arith.constant 8 : index
    %2 = vector.load %arg1[%c8_2, %c8_3] : memref<18x37xf32, #tpu.memory_space<vmem>>, vector<10x1xf32>
    %c0_4 = arith.constant 0 : index
    %c0_5 = arith.constant 0 : index
    %3 = vector.load %arg0[%c0_4, %c0_5] : memref<37x512xf32, #tpu.memory_space<vmem>>, vector<37x512xf32>
    %cst = arith.constant dense<0.000000e+00> : vector<8x512xf32>
    %4 = tpu.matmul %0, %3, %cst {dimension_numbers = #tpu.dot_dimension_numbers<[1], [0], [0], [1], [0, 0, 1, 1], [], []>, precision = #tpu.contract_precision<fp32>} : vector<8x37xf32>, vector<37x512xf32>, vector<8x512xf32> -> vector<8x512xf32>
    %cst_6 = arith.constant 0.000000e+00 : f32
    %5 = vector.broadcast %cst_6 : f32 to vector<8x512xf32>
    %6 = arith.maximumf %4, %5 : vector<8x512xf32>
    %7 = vector.extract_strided_slice %6 {offsets = [0, 0], sizes = [8, 256], strides = [1, 1]} : vector<8x512xf32> to vector<8x256xf32>
    %cst_7 = arith.constant dense<0.000000e+00> : vector<8xf32>
    %8 = vector.multi_reduction <add>, %7, %cst_7 [1] : vector<8x256xf32> to vector<8xf32>
    %9 = vector.shape_cast %8 : vector<8xf32> to vector<8x1xf32>
    %10 = vector.extract_strided_slice %6 {offsets = [0, 256], sizes = [8, 256], strides = [1, 1]} : vector<8x512xf32> to vector<8x256xf32>
    %cst_8 = arith.constant dense<0.000000e+00> : vector<8xf32>
    %11 = vector.multi_reduction <add>, %10, %cst_8 [1] : vector<8x256xf32> to vector<8xf32>
    %12 = vector.shape_cast %11 : vector<8xf32> to vector<8x1xf32>
    %13 = tpu.concatenate %9, %12 in 1 : vector<8x1xf32>, vector<8x1xf32> -> vector<8x2xf32>
    %cst_9 = arith.constant dense<0.000000e+00> : vector<10x2xf32>
    %14 = tpu.matmul %1, %13, %cst_9 {dimension_numbers = #tpu.dot_dimension_numbers<[1], [0], [0], [1], [0, 0, 1, 1], [], []>, precision = #tpu.contract_precision<fp32>} : vector<10x8xf32>, vector<8x2xf32>, vector<10x2xf32> -> vector<10x2xf32>
    %15 = vector.broadcast %2 : vector<10x1xf32> to vector<10x2xf32>
    %16 = arith.addf %14, %15 : vector<10x2xf32>
    %c0_10 = arith.constant 0 : index
    %c0_11 = arith.constant 0 : index
    %17 = vector.load %arg2[%c0_10, %c0_11] : memref<10x2xf32, #tpu.memory_space<vmem>>, vector<10x2xf32>
    tpu.vector_store %arg2[%c0_10, %c0_11], %16 {strides = array<i32>} : memref<10x2xf32, #tpu.memory_space<vmem>>, vector<10x2xf32>,
    return
  }
}

</mosaic_0001>

<bundles_post_ra>
// kernel: light_classification_forward.1
= control target key start
LH: loop header
LB: loop body
LE: loop exit
PB: predicated region body
PF: predicated region fallthrough
CT: control target
= control target key end

     0   :  { %vm38_vm0 = vcmask 1044480   ;;  %vm34_vm1 = vcmask 302080   ;;  %vm865_vm2 = vcmask 64512   ;;  %vm853_vm3 = vcmask 7168   ;;  %s1458_s0 = inlined_call_operand.vmem [shape: f32[37,512], index: 0, kind: input, shape index: {}]   ;;  %s1459_s1 = inlined_call_operand.vmem [shape: f32[18,37], index: 1, kind: input, shape index: {}]   ;;  %s1460_s2 = inlined_call_operand.vmem [shape: f32[10,2], index: 2, kind: output, shape index: {}]  }
   0x1   :  { %v30_v0 = vld [vmem:[%s1458_s0 + $0x80] sm:$0x1f]  ;;  %v31_v12 = vld [vmem:[%s1458_s0 + $0x88] sm:$0x1f]  ;;  %vm1047_vm4 = vcmask 15360   ;;  %vm1049_vm5 = vcmask 9216  }
   0x2   :  { %v26_v1 = vld [vmem:[%s1458_s0 + $0x60] sm:$0xff]  ;;  %v40_v3 = vsel %vm38_vm0, %v30_v0, 0  ;;  %v43_v16 = vsel %vm38_vm0, %v31_v12, 0  ;;  %v27_v18 = vld [vmem:[%s1458_s0 + $0x68] sm:$0xff] }
   0x3   :  { %v22_v2 = vld [vmem:[%s1458_s0 + $0x40] sm:$0xff]  ;;  %v1086_v4 = vand.u32 4294901760, %v26_v1  ;;  %v1099_v9 = vand.u32 4294901760, %v40_v3  ;;  %v1129_v22 = vand.u32 4294901760, %v43_v16  ;;  %v1136_v26 = vand.u32 4294901760, %v27_v18  ;;  %v23_v37 = vld [vmem:[%s1458_s0 + $0x48] sm:$0xff] }
   0x4   :  { %v1088_v5 = vand.u32 4294901760, %v22_v2  ;;  %v18_v6 = vld [vmem:[%s1458_s0 + $0x20] sm:$0xff]  ;;  %v19_v38 = vld [vmem:[%s1458_s0 + $0x28] sm:$0xff]  ;;  %v1183_v47 = vand.u32 4294901760, %v23_v37 }
   0x5   :  { %v14_v7 = vld [vmem:[%s1458_s0] sm:$0xff]  ;;  %v1101_v10 = vand.u32 4294901760, %v18_v6  ;;  %v1109_v14 = vsub.f32 %v26_v1, %v1086_v4  ;;  %63 = vmatpush.msra.mxu0 %v1099_v9  ;;  %v93_v19 = vsub.f32 %v40_v3, %v1099_v9  ;;  %171 = vmatpush.msra.mxu3 %v1099_v9  ;;  %v1141_v29 = vsub.f32 %v43_v16, %v1129_v22  ;;  %v15_v40 = vld [vmem:[%s1458_s0 + $0x8] sm:$0xff]  ;;  %v32_v3 = vld [vmem:[%s1458_s0 + $0x90] sm:$0x1f] }
   0x6   :  { %v11_v8 = vld [vmem:[%s1459_s1] sm:$0xff]  ;;  %v1103_v11 = vand.u32 4294901760, %v14_v7  ;;  %v1112_v15 = vsub.f32 %v22_v2, %v1088_v5  ;;  %v1146_v31 = vsub.f32 %v27_v18, %v1136_v26  ;;  %v1185_v48 = vand.u32 4294901760, %v19_v38 }
   0x7   :  { %v36_v13 = vsel %vm34_vm1, %v11_v8, 0  ;;  %v1124_v20 = vsub.f32 %v18_v6, %v1101_v10  ;;  %v100_v23 = vand.u32 4294901760, %v1109_v14  ;;  %140 = vmatpush.msra.mxu2 %v93_v19  ;;  %65 = vmatpush.msra.mxu0 %v1086_v4  ;;  %v94_v27 = vand.u32 4294901760, %v93_v19 }
   0x8   :  { %v1115_v17 = vand.u32 4294901760, %v36_v13  ;;  %v1127_v21 = vsub.f32 %v14_v7, %v1103_v11  ;;  %v106_v24 = vand.u32 4294901760, %v1112_v15  ;;  %173 = vmatpush.msra.mxu3 %v1086_v4  ;;  %v292_v35 = vand.u32 4294901760, %v1141_v29 }
   0x9   :  { %v112_v28 = vand.u32 4294901760, %v1124_v20  ;;  %v101_v30 = vsub.f32 %v1109_v14, %v100_v23  ;;  %143 = vmatpush.msra.mxu2 %v1109_v14  ;;  %67 = vmatpush.msra.mxu0 %v1088_v5  ;;  %v95_v33 = vsub.f32 %v93_v19, %v94_v27  ;;  %v298_v39 = vand.u32 4294901760, %v1146_v31 }
   0xa   :  { %v1134_v25 = vsub.f32 %v36_v13, %v1115_v17  ;;  %v107_v34 = vsub.f32 %v1112_v15, %v106_v24  ;;  %v118_v36 = vand.u32 4294901760, %v1127_v21  ;;  %175 = vmatpush.msra.mxu3 %v1088_v5  ;;  %v293_v44 = vsub.f32 %v1141_v29, %v292_v35  ;;  %v33_v13 = vld [vmem:[%s1458_s0 + $0x98] sm:$0x1f] }
   0xb   :  { %v96_v41 = vand.u32 4294901760, %v95_v33  ;;  %146 = vmatpush.msra.mxu2 %v1112_v15  ;;  %69 = vmatpush.msra.mxu0 %v1101_v10  ;;  %v102_v42 = vand.u32 4294901760, %v101_v30  ;;  %v113_v43 = vsub.f32 %v1124_v20, %v112_v28  ;;  %v299_v45 = vsub.f32 %v1146_v31, %v298_v39 }
   0xc   :  { %v1149_v32 = vand.u32 4294901760, %v1134_v25  ;;  %177 = vmatpush.msra.mxu3 %v1101_v10  ;;  %v108_v49 = vand.u32 4294901760, %v107_v34  ;;  %v294_v50 = vand.u32 4294901760, %v293_v44  ;;  %v119_v51 = vsub.f32 %v1127_v21, %v118_v36  ;;  %v21_v34 = vld [vmem:[%s1458_s0 + $0x38] sm:$0xff] }
   0xd   :  { %97 = vmatpush.msra.mxu1 %v96_v41  ;;  %149 = vmatpush.msra.mxu2 %v1124_v20  ;;  %v1191_v52 = vand.u32 4294901760, %v15_v40  ;;  %v1196_v53 = vsub.f32 %v23_v37, %v1183_v47  ;;  %v1199_v54 = vsub.f32 %v19_v38, %v1185_v48  ;;  %v114_v55 = vand.u32 4294901760, %v113_v43  ;;  %v16_v20 = vld [vmem:[%s1458_s0 + $0x10] sm:$0xff] }
   0xe   :  { %v75_v46 = vsub.f32 %v1134_v25, %v1149_v32  ;;  %71 = vmatpush.msra.mxu0 %v1103_v11  ;;  %179 = vmatpush.msra.mxu3 %v1103_v11  ;;  %v300_v57 = vand.u32 4294901760, %v299_v45  ;;  %v120_v61 = vand.u32 4294901760, %v119_v51  ;;  %v46_v8 = vsel %vm38_vm0, %v32_v3, 0 }
   0xf   :  { %103 = vmatpush.msra.mxu1 %v102_v42  ;;  %152 = vmatpush.msra.mxu2 %v1127_v21  ;;  %v1203_v56 = vsub.f32 %v15_v40, %v1191_v52  ;;  %v304_v59 = vand.u32 4294901760, %v1196_v53  ;;  %v310_v60 = vand.u32 4294901760, %v1199_v54  ;;  %v1242_v12 = vand.u32 4294901760, %v46_v8 }
  0x10   :  { %201 = vmatpush.msrb.mxu0 %v94_v27  ;;  %v1206_v58 = vand.u32 4294901760, %v75_v46  ;;  %295 = vmatpush.msrb.mxu3 %v294_v50  ;;  %v49_v16 = vsel %vm38_vm0, %v33_v13, 0  ;;  %v1300_v27 = vand.u32 4294901760, %v16_v20  ;;  %v1347_v42 = vand.u32 4294901760, %v21_v34 }
  0x11   :  { %261 = vmatpush.msrb.mxu2 %v1129_v22  ;;  %109 = vmatpush.msra.mxu1 %v108_v49  ;;  %v316_v62 = vand.u32 4294901760, %v1203_v56  ;;  %v305_v63 = vsub.f32 %v1196_v53, %v304_v59  ;;  %v311_v0 = vsub.f32 %v1199_v54, %v310_v60  ;;  %v1262_v14 = vsub.f32 %v46_v8, %v1242_v12 }
  0x12   :  { %155 = vmatmul.f32.vlgmr.msra.gmra.mxu2 %v1134_v25  ;;  %205 = vmatpush.msrb.mxu0 %v100_v23  ;;  %v1284_v21 = vand.u32 4294901760, %v49_v16  ;;  %v1335_v37 = vsub.f32 %v16_v20, %v1300_v27 }
  0x13   :  { %115 = vmatpush.msra.mxu1 %v114_v55  ;;  %263 = vmatpush.msrb.mxu2 %v1136_v26  ;;  %v306_v1 = vand.u32 4294901760, %v305_v63  ;;  %v317_v2 = vsub.f32 %v1203_v56, %v316_v62  ;;  %v312_v6 = vand.u32 4294901760, %v311_v0  ;;  %v490_v23 = vand.u32 4294901760, %v1262_v14 }
  0x14   :  { %301 = vmatpush.msrb.mxu3 %v300_v57  ;;  %77 = vmatmul.f32.vlgmr.msra.gmra.mxu0 %v1206_v58 }
  0x15   :  { %121 = vmatpush.msra.mxu1 %v120_v61  ;;  %183 = vmatmul.f32.vlgmr.msra.gmra.mxu3 %v1149_v32  ;;  %v318_v7 = vand.u32 4294901760, %v317_v2 }
  0x16   :  { %209 = vmatpush.msrb.mxu0 %v106_v24  ;;  %265 = vmatpush.msrb.mxu2 %v1183_v47 }
  0x17   :  { %235 = vmatpush.msrb.mxu1 %v1099_v9  ;;  %307 = vmatpush.msrb.mxu3 %v306_v1  ;;  %v28_v9 = vld [vmem:[%s1458_s0 + $0x70] sm:$0xff] }
  0x18   :  { %123 = vmatmul.f32.vlgmr.msra.gmra.mxu1 %v1115_v17  ;;  %213 = vmatpush.msrb.mxu0 %v112_v28 }
  0x19   :  { %237 = vmatpush.msrb.mxu1 %v1086_v4  ;;  %267 = vmatpush.msrb.mxu2 %v1185_v48  ;;  %v24_v4 = vld [vmem:[%s1458_s0 + $0x50] sm:$0xff] }
  0x1a   :  { %313 = vmatpush.msrb.mxu3 %v312_v6  ;;  %217 = vmatpush.msrb.mxu0 %v118_v36  ;;  %v1264_v15 = vand.u32 4294901760, %v24_v4 }
  0x1b   :  { %239 = vmatpush.msrb.mxu1 %v1088_v5  ;;  %269 = vmatpush.msrb.mxu2 %v1191_v52  ;;  %v1254_v5 = vand.u32 4294901760, %v28_v9 }
  0x1c   :  { %319 = vmatpush.msrb.mxu3 %v318_v7  ;;  %338 = vmatpush.msra.mxu0 %v1141_v29  ;;  %v1292_v24 = vsub.f32 %v24_v4, %v1264_v15  ;;  %v25_v29 = vld [vmem:[%s1458_s0 + $0x58] sm:$0xff] }
  0x1d   :  { %399 = vmatpush.msra.mxu2 %v292_v35  ;;  %241 = vmatpush.msrb.mxu1 %v1101_v10  ;;  %v20_v10 = vld [vmem:[%s1458_s0 + $0x30] sm:$0xff]  ;;  %v1275_v18 = vsub.f32 %v28_v9, %v1254_v5  ;;  %v1327_v35 = vand.u32 4294901760, %v25_v29 }
  0x1e   :  { %275 = vmatmul.f32.vlgmr.msrb.gmra.mxu2 %v1206_v58  ;;  %433 = vmatpush.msra.mxu3 %v1129_v22  ;;  %v1279_v19 = vand.u32 4294901760, %v20_v10  ;;  %v502_v33 = vand.u32 4294901760, %v1292_v24 }
  0x1f   :  { %341 = vmatpush.msra.mxu0 %v1146_v31  ;;  %403 = vmatpush.msra.mxu2 %v298_v39  ;;  %v491_v31 = vsub.f32 %v1262_v14, %v490_v23  ;;  %v17_v39 = vld [vmem:[%s1458_s0 + $0x18] sm:$0xff]  ;;  %v1357_v45 = vsub.f32 %v25_v29, %v1327_v35 }
  0x20   :  { %219 = vmatmul.f32.vlgmr.msrb.gmra.mxu0 %v1115_v17  ;;  %243 = vmatpush.msrb.mxu1 %v1103_v11  ;;  %v29_v11 = vld [vmem:[%s1458_s0 + $0x78] sm:$0xff]  ;;  %v1310_v30 = vsub.f32 %v20_v10, %v1279_v19  ;;  %v503_v44 = vsub.f32 %v1292_v24, %v502_v33  ;;  %v1359_v46 = vand.u32 4294901760, %v17_v39 }
  0x21   :  { %321 = vmatmul.f32.vlgmr.msrb.gmra.mxu3 %v1115_v17  ;;  %344 = vmatpush.msra.mxu0 %v1196_v53  ;;  %v1302_v28 = vand.u32 4294901760, %v29_v11  ;;  %v492_v43 = vand.u32 4294901760, %v491_v31 }
  0x22   :  { %435 = vmatpush.msra.mxu3 %v1136_v26  ;;  %369 = vmatpush.msra.mxu1 %v1129_v22  ;;  %v496_v22 = vand.u32 4294901760, %v1275_v18  ;;  %v508_v40 = vand.u32 4294901760, %v1310_v30  ;;  %v504_v53 = vand.u32 4294901760, %v503_v44  ;;  %v1381_v55 = vsub.f32 %v17_v39, %v1359_v46 }
  0x23   :  { %407 = vmatpush.msra.mxu2 %v304_v59  ;;  %245 = vmatmul.f32.vlgmr.msrb.gmra.mxu1 %v1115_v17  ;;  %v1338_v38 = vsub.f32 %v29_v11, %v1302_v28 }
  0x24   :  { %437 = vmatpush.msra.mxu3 %v1183_v47  ;;  %347 = vmatpush.msra.mxu0 %v1199_v54  ;;  %v497_v36 = vsub.f32 %v1275_v18, %v496_v22  ;;  %v509_v50 = vsub.f32 %v1310_v30, %v508_v40  ;;  %v700_v54 = vand.u32 4294901760, %v1357_v45  ;;  %v712_v63 = vand.u32 4294901760, %v1381_v55 }
  0x25   :  { %371 = vmatpush.msra.mxu1 %v1136_v26  ;;  %411 = vmatpush.msra.mxu2 %v310_v60  ;;  %v1313_v26 = vsub.f32 %v49_v16, %v1284_v21  ;;  %v694_v49 = vand.u32 4294901760, %v1338_v38 }
  0x26   :  { %439 = vmatpush.msra.mxu3 %v1185_v48  ;;  %350 = vmatpush.msra.mxu0 %v1203_v56  ;;  %v510_v59 = vand.u32 4294901760, %v509_v50  ;;  %v713_v6 = vsub.f32 %v1381_v55, %v712_v63 }
  0x27   :  { %373 = vmatpush.msra.mxu1 %v1183_v47  ;;  %415 = vmatpush.msra.mxu2 %v316_v62  ;;  %v688_v41 = vand.u32 4294901760, %v1313_v26  ;;  %v498_v47 = vand.u32 4294901760, %v497_v36  ;;  %v695_v57 = vsub.f32 %v1338_v38, %v694_v49  ;;  %v701_v62 = vsub.f32 %v1357_v45, %v700_v54 }
  0x28   :  { %417 = vmatmul.f32.vlgmr.msra.gmra.mxu2 %v1115_v17  ;;  %441 = vmatpush.msra.mxu3 %v1191_v52  ;;  %v714_v8 = vand.u32 4294901760, %v713_v6 }
  0x29   :  { %459 = vmatpush.msrb.mxu0 %v1242_v12  ;;  %536 = vmatpush.msrb.mxu2 %v1262_v14  ;;  %v689_v51 = vsub.f32 %v1313_v26, %v688_v41  ;;  %v696_v1 = vand.u32 4294901760, %v695_v57  ;;  %v702_v3 = vand.u32 4294901760, %v701_v62  ;;  %v12_v57 = vld [vmem:[%s1459_s1 + $0x8] sm:$0xff] }
  0x2a   :  { %375 = vmatpush.msra.mxu1 %v1185_v48  ;;  %567 = vmatpush.msrb.mxu3 %v1242_v12  ;;  %v514_v48 = vand.u32 4294901760, %v1335_v37 }
  0x2b   :  { %353 = vmatmul.f32.vlgmr.msra.gmra.mxu0 %v1134_v25  ;;  %443 = vmatmul.f32.vlgmr.msra.gmra.mxu3 %v1115_v17  ;;  %v690_v60 = vand.u32 4294901760, %v689_v51 }
  0x2c   :  { %461 = vmatpush.msrb.mxu0 %v1254_v5  ;;  %539 = vmatpush.msrb.mxu2 %v1275_v18  ;;  %v515_v56 = vsub.f32 %v1335_v37, %v514_v48 }
  0x2d   :  { %377 = vmatpush.msra.mxu1 %v1191_v52  ;;  %569 = vmatpush.msrb.mxu3 %v1254_v5  ;;  %v1374_v52 = vsub.f32 %v21_v34, %v1347_v42 }
  0x2e   :  { %381 = vmatmul.f32.vlgmr.msra.gmra.mxu1 %v1149_v32  ;;  %463 = vmatpush.msrb.mxu0 %v1264_v15  ;;  %v516_v0 = vand.u32 4294901760, %v515_v56  ;;  %v13_v56 = vld [vmem:[%s1459_s1 + $0x10] sm:$0x3] }
  0x2f   :  { %493 = vmatpush.msrb.mxu1 %v492_v43  ;;  %542 = vmatpush.msrb.mxu2 %v1292_v24  ;;  %v706_v61 = vand.u32 4294901760, %v1374_v52 }
  0x30   :  { %571 = vmatpush.msrb.mxu3 %v1264_v15  ;;  %465 = vmatpush.msrb.mxu0 %v1279_v19 }
  0x31   :  { %499 = vmatpush.msrb.mxu1 %v498_v47  ;;  %545 = vmatpush.msrb.mxu2 %v1310_v30  ;;  %v707_v2 = vsub.f32 %v1374_v52, %v706_v61 }
  0x32   :  { %573 = vmatpush.msrb.mxu3 %v1279_v19  ;;  %467 = vmatpush.msrb.mxu0 %v1300_v27 }
  0x33   :  { %505 = vmatpush.msrb.mxu1 %v504_v53  ;;  %548 = vmatpush.msrb.mxu2 %v1335_v37  ;;  %v708_v7 = vand.u32 4294901760, %v707_v2 }
  0x34   :  { %551 = vmatmul.f32.vlgmr.msrb.gmra.mxu2 %v1134_v25  ;;  %575 = vmatpush.msrb.mxu3 %v1300_v27 }
  0x35   :  { %597 = vmatpush.msra.mxu0 %v490_v23  ;;  %657 = vmatpush.msra.mxu2 %v1284_v21 }
  0x36   :  { %511 = vmatpush.msrb.mxu1 %v510_v59  ;;  %691 = vmatpush.msra.mxu3 %v690_v60  ;;  %v868_v59 = vsel %vm865_vm2, %v13_v56, 0  ;;  %v866_v60 = vsel %vm865_vm2, %v12_v57, 0 }
  0x37   :  { %473 = vmatmul.f32.vlgmr.msrb.gmra.mxu0 %v1206_v58  ;;  %579 = vmatmul.f32.vlgmr.msrb.gmra.mxu3 %v1149_v32  ;;  %v887_v62 = vand.u32 4294901760, %v866_v60 }
  0x38   :  { %601 = vmatpush.msra.mxu0 %v496_v22  ;;  %659 = vmatpush.msra.mxu2 %v1302_v28 }
  0x39   :  { %517 = vmatpush.msrb.mxu1 %v516_v0  ;;  %697 = vmatpush.msra.mxu3 %v696_v1  ;;  %v888_v1 = vsub.f32 %v866_v60, %v887_v62 }
  0x3a   :  { %519 = vmatmul.f32.vlgmr.msrb.gmra.mxu1 %v1115_v17  ;;  %605 = vmatpush.msra.mxu0 %v502_v33 }
  0x3b   :  { %631 = vmatpush.msra.mxu1 %v1242_v12  ;;  %661 = vmatpush.msra.mxu2 %v1327_v35  ;;  %v889_v6 = vand.u32 4294901760, %v888_v1 }
  0x3c   :  { %703 = vmatpush.msra.mxu3 %v702_v3  ;;  %609 = vmatpush.msra.mxu0 %v508_v40 }
  0x3d   :  { %633 = vmatpush.msra.mxu1 %v1254_v5  ;;  %663 = vmatpush.msra.mxu2 %v1347_v42 }
  0x3e   :  { %709 = vmatpush.msra.mxu3 %v708_v7  ;;  %613 = vmatpush.msra.mxu0 %v514_v48 }
  0x3f   :  { %635 = vmatpush.msra.mxu1 %v1264_v15  ;;  %665 = vmatpush.msra.mxu2 %v1359_v46 }
  0x40   :  { %715 = vmatpush.msra.mxu3 %v714_v8  ;;  %734 = vmatpush.msrb.mxu0 %v1313_v26  ;;  %v890_v8 = vsub.f32 %v888_v1, %v889_v6 }
  0x41   :  { %795 = vmatpush.msrb.mxu2 %v688_v41  ;;  %615 = vmatmul.f32.vlgmr.msra.gmra.mxu0 %v1115_v17 }
  0x42   :  { %637 = vmatpush.msra.mxu1 %v1279_v19  ;;  %671 = vmatmul.f32.vlgmr.msra.gmra.mxu2 %v1206_v58 }
  0x43   :  { %717 = vmatmul.f32.vlgmr.msra.gmra.mxu3 %v1115_v17  ;;  %737 = vmatpush.msrb.mxu0 %v1338_v38 }
  0x44   :  { %799 = vmatpush.msrb.mxu2 %v694_v49  ;;  %829 = vmatpush.msrb.mxu3 %v1284_v21 }
  0x45   :  { %639 = vmatpush.msra.mxu1 %v1300_v27  ;;  %740 = vmatpush.msrb.mxu0 %v1357_v45 }
  0x46   :  { %641 = vmatmul.f32.vlgmr.msra.gmra.mxu1 %v1115_v17  ;;  %803 = vmatpush.msrb.mxu2 %v700_v54 }
  0x47   :  { %765 = vmatpush.msrb.mxu1 %v1284_v21  ;;  %831 = vmatpush.msrb.mxu3 %v1302_v28 }
  0x48   :  { %743 = vmatpush.msrb.mxu0 %v1374_v52  ;;  %807 = vmatpush.msrb.mxu2 %v706_v61  ;;  %v895_v61 = vand.u32 4294901760, %v868_v59 }
  0x49   :  { %767 = vmatpush.msrb.mxu1 %v1302_v28  ;;  %833 = vmatpush.msrb.mxu3 %v1327_v35 }
  0x4a   :  { %746 = vmatpush.msrb.mxu0 %v1381_v55  ;;  %811 = vmatpush.msrb.mxu2 %v712_v63  ;;  %v1060_v63 = vmov 8   ;;  %v896_v0 = vsub.f32 %v868_v59, %v895_v61 }
  0x4b   :  { %769 = vmatpush.msrb.mxu1 %v1327_v35  ;;  %835 = vmatpush.msrb.mxu3 %v1347_v42 }
  0x4c   :  { %749 = vmatmul.f32.vlgmr.msrb.gmra.mxu0 %v1134_v25  ;;  %813 = vmatmul.f32.vlgmr.msrb.gmra.mxu2 %v1115_v17  ;;  %v897_v3 = vand.u32 4294901760, %v896_v0 }
  0x4d   :  { %771 = vmatpush.msrb.mxu1 %v1347_v42  ;;  %837 = vmatpush.msrb.mxu3 %v1359_v46 }
  0x4e   :  { %839 = vmatmul.f32.vlgmr.msrb.gmra.mxu3 %v1115_v17  ;;  %1058 = vset.pattern.permute.xlu1 %v1060_v63  ;;  %v898_v7 = vsub.f32 %v896_v0, %v897_v3 }
  0x4f   :  { %773 = vmatpush.msrb.mxu1 %v1359_v46  ;;  %1059 = vset.pattern.permute.xlu0 %v1060_v63 }
  0x50   :  { %777 = vmatmul.f32.vlgmr.msrb.gmra.mxu1 %v1149_v32  ;;  %857 = vperm.xlu1 %1058, %v12_v57  }
  0x58   :  { %862 = vperm.xlu1 %1058, %v13_v56  }
  0x91   :  { %v78_v58 = vpop.f32.mrf.mxu0 }
  0x95   :  { %v124_v9 = vpop.f32.mrf.mxu1  ;;  %v156_v12 = vpop.f32.mrf.mxu2 }
  0x96   :  { %v125_v13 = vadd.f32 %v124_v9, %v78_v58 }
  0x98   :  { %v184_v4 = vpop.f32.mrf.mxu3  ;;  %v157_v15 = vadd.f32 %v156_v12, %v125_v13  ;;  %v899_v12 = vand.u32 4294901760, %v898_v7 }
  0x9a   :  { %v185_v18 = vadd.f32 %v184_v4, %v157_v15  ;;  %v891_v4 = vand.u32 4294901760, %v890_v8 }
  0x9d   :  { %v220_v5 = vpop.f32.mrf.mxu0 }
  0x9e   :  { %v221_v21 = vadd.f32 %v220_v5, %v185_v18 }
  0xa0   :  { %v246_v14 = vpop.f32.mrf.mxu1 }
  0xa1   :  { %v276_v25 = vpop.f32.mrf.mxu2  ;;  %v247_v24 = vadd.f32 %v246_v14, %v221_v21 }
  0xa3   :  { %v843_v28 = vmax.f32 %v247_v24, 0.0 }
  0xa4   :  { %v322_v10 = vpop.f32.mrf.mxu3 }
  0xa5   :  { %v323_v16 = vadd.f32 %v322_v10, %v276_v25 }
  0xa8   :  { %v354_v19 = vpop.f32.mrf.mxu0 }
  0xa9   :  { %v355_v20 = vadd.f32 %v354_v19, %v323_v16 }
  0xab   :  { %v382_v17 = vpop.f32.mrf.mxu1  ;;  %v418_v11 = vpop.f32.mrf.mxu2 }
  0xac   :  { %v383_v23 = vadd.f32 %v382_v17, %v355_v20 }
  0xae   :  { %v419_v32 = vadd.f32 %v418_v11, %v383_v23  ;;  %v444_v22 = vpop.f32.mrf.mxu3 }
  0xb0   :  { %v445_v27 = vadd.f32 %v444_v22, %v419_v32 }
  0xb2   :  { %v844_v29 = vmax.f32 %v445_v27, 0.0 }
  0xb4   :  { %v847_v30 = vadd.f32 %v844_v29, %v843_v28  ;;  %v474_v26 = vpop.f32.mrf.mxu0 }
  0xb6   :  { %848 = vadd.xlane.f32.xlu0 %v847_v30 }
  0xb7   :  { %v520_v31 = vpop.f32.mrf.mxu1  ;;  %v552_v34 = vpop.f32.mrf.mxu2 }
  0xb8   :  { %v521_v36 = vadd.f32 %v520_v31, %v474_v26 }
  0xba   :  { %v580_v33 = vpop.f32.mrf.mxu3  ;;  %v553_v38 = vadd.f32 %v552_v34, %v521_v36 }
  0xbc   :  { %v581_v41 = vadd.f32 %v580_v33, %v553_v38 }
  0xbe   :  { %v616_v35 = vpop.f32.mrf.mxu0 }
  0xbf   :  { %v617_v44 = vadd.f32 %v616_v35, %v581_v41 }
  0xc2   :  { %v858_v18 = vpop.permute.xlu1 %857 }
  0xc3   :  { %v642_v37 = vpop.f32.mrf.mxu1 }
  0xc4   :  { %v643_v49 = vadd.f32 %v642_v37, %v617_v44 }
  0xc5   :  { %v672_v39 = vpop.f32.mrf.mxu2 }
  0xc6   :  { %v718_v40 = vpop.f32.mrf.mxu3  ;;  %v845_v53 = vmax.f32 %v643_v49, 0.0 }
  0xc7   :  { %v719_v42 = vadd.f32 %v718_v40, %v672_v39 }
  0xc9   :  { %v750_v43 = vpop.f32.mrf.mxu0 }
  0xca   :  { %v751_v45 = vadd.f32 %v750_v43, %v719_v42  ;;  %v863_v24 = vpop.permute.xlu1 %862 }
  0xcd   :  { %v778_v46 = vpop.f32.mrf.mxu1 }
  0xce   :  { %v779_v47 = vadd.f32 %v778_v46, %v751_v45 }
  0xcf   :  { %v814_v48 = vpop.f32.mrf.mxu2 }
  0xd0   :  { %v815_v50 = vadd.f32 %v814_v48, %v779_v47 }
  0xd1   :  { %v840_v51 = vpop.f32.mrf.mxu3 }
  0xd2   :  { %v841_v52 = vadd.f32 %v840_v51, %v815_v50 }
  0xd4   :  { %v846_v54 = vmax.f32 %v841_v52, 0.0 }
  0xd6   :  { %v850_v55 = vadd.f32 %v846_v54, %v845_v53 }
  0xd8   :  { %851 = vadd.xlane.f32.xlu0 %v850_v55 }
 0x129   :  { %v849_v2 = vpop.xlane.xlu0 %848 }
 0x14b   :  { %v852_v58 = vpop.xlane.xlu0 %851 }
 0x14c   :  { %v854_v9 = vsel %vm853_vm3, %v849_v2, %v852_v58 }
 0x14d   :  { %v885_v13 = vand.u32 4294901760, %v854_v9 }
 0x14f   :  { %v920_v5 = vsub.f32 %v854_v9, %v885_v13  ;;  %886 = vmatpush.msra.mxu0 %v885_v13  ;;  %1055 = vmatpush.msra.mxu2 %v885_v13 }
 0x150   :  { %900 = vmatmul.f32.vlgmr.msra.gmra.mxu2 %v899_v12  ;;  %892 = vmatmul.f32.vlgmr.msra.gmra.mxu0 %v891_v4 }
 0x151   :  { %v921_v14 = vand.u32 4294901760, %v920_v5  ;;  %951 = vmatpush.msrb.mxu2 %v920_v5 }
 0x153   :  { %v922_v25 = vsub.f32 %v920_v5, %v921_v14  ;;  %1011 = vmatpush.msrb.mxu0 %v921_v14 }
 0x155   :  { %v923_v15 = vand.u32 4294901760, %v922_v25 }
 0x157   :  { %924 = vmatpush.msra.mxu1 %v923_v15  ;;  %1056 = vmatpush.msra.mxu3 %v923_v15 }
 0x158   :  { %930 = vmatmul.f32.vlgmr.msra.gmra.mxu3 %v895_v61  ;;  %954 = vmatmul.f32.vlgmr.msrb.gmra.mxu2 %v888_v1 }
 0x159   :  { %1037 = vmatpush.msrb.mxu1 %v885_v13  ;;  %979 = vmatpush.msrb.mxu3 %v885_v13 }
 0x15a   :  { %926 = vmatmul.f32.vlgmr.msra.gmra.mxu1 %v887_v62  ;;  %1013 = vmatmul.f32.vlgmr.msrb.gmra.mxu0 %v887_v62 }
 0x160   :  { %983 = vmatmul.f32.vlgmr.msrb.gmra.mxu3 %v889_v6  ;;  %959 = vmatmul.f32.gmra.mxu2 %v896_v0 }
 0x162   :  { %1039 = vmatmul.f32.vlgmr.msrb.gmra.mxu1 %v887_v62  ;;  %1017 = vmatmul.f32.gmra.mxu0 %v895_v61 }
 0x168   :  { %989 = vmatmul.f32.gmra.mxu3 %v897_v3 }
 0x16a   :  { %1043 = vmatmul.f32.gmra.mxu1 %v895_v61 }
 0x1cd   :  { %v893_v16 = vpop.f32.mrf.mxu0 }
 0x1ce   :  { %v894_v19 = vadd.f32 %v893_v16, %v858_v18 }
 0x1d3   :  { %v901_v10 = vpop.f32.mrf.mxu2 }
 0x1d4   :  { %v902_v28 = vadd.f32 %v901_v10, %v863_v24 }
 0x1d7   :  { %v927_v20 = vpop.f32.mrf.mxu1  ;;  %v1014_v32 = vpop.f32.mrf.mxu0 }
 0x1d8   :  { %v928_v17 = vadd.f32 %v927_v20, %v894_v19 }
 0x1db   :  { %v931_v21 = vpop.f32.mrf.mxu3  ;;  %v955_v11 = vpop.f32.mrf.mxu2 }
 0x1dc   :  { %v956_v23 = vadd.f32 %v955_v11, %v928_v17  ;;  %v932_v31 = vadd.f32 %v931_v21, %v902_v28 }
 0x1df   :  { %v1040_v27 = vpop.f32.mrf.mxu1  ;;  %v1018_v36 = vpop.f32.mrf.mxu0 }
 0x1e3   :  { %v984_v22 = vpop.f32.mrf.mxu3  ;;  %v960_v26 = vpop.f32.mrf.mxu2 }
 0x1e4   :  { %v985_v29 = vadd.f32 %v984_v22, %v956_v23  ;;  %v961_v34 = vadd.f32 %v960_v26, %v932_v31 }
 0x1e6   :  { %v1015_v30 = vadd.f32 %v1014_v32, %v985_v29 }
 0x1e7   :  { %v1044_v38 = vpop.f32.mrf.mxu1 }
 0x1e8   :  { %v1041_v33 = vadd.f32 %v1040_v27, %v1015_v30 }
 0x1ea   :  { %1048 = vst.msk [vmem:[%s1460_s2] sm:$0xff] %vm1047_vm4, %v1041_v33 }
 0x1eb   :  { %v990_v35 = vpop.f32.mrf.mxu3 }
 0x1ec   :  { %v991_v37 = vadd.f32 %v990_v35, %v961_v34 }
 0x1ee   :  { %v1019_v39 = vadd.f32 %v1018_v36, %v991_v37 }
 0x1f0   :  { %v1045_v40 = vadd.f32 %v1044_v38, %v1019_v39 }
 0x1f2   :  { %1050 = vst.msk [vmem:[%s1460_s2 + $0x8] sm:$0x3] %vm1049_vm5, %v1045_v40 }

</bundles_post_ra>
